<compile_context>
chip_gen: v7x
topology: tpu7x:2x2x1
jax: 0.10.0
libtpu: 0.0.40
codegen_flags: <defaults>
</compile_context>

<pallas_src>
import functools

import jax
import jax.numpy as jnp
from jax import lax
from jax.experimental import pallas as pl
from jax.experimental.pallas import tpu as pltpu

_LANES = 128
_SUBLANES = 8
_ROW_TARGET = 512   # target M rows (TB * S_pad) per grid step


def _layer_norm(h, gamma, beta, *, n_real, eps=1e-5):
    """LayerNorm over the last dim, counting only the first n_real columns.

    Padded embed columns of `h` are exactly zero (zero-padded weights/biases/residuals),
    so sum(h) and sum(h*h) over the padded axis equal the sums over the real columns;
    dividing by n_real reproduces nn.LayerNorm exactly.  Padded gamma/beta columns are
    zero, so padded output columns stay zero.
    """
    inv_n = jnp.float32(1.0 / n_real)
    mean = jnp.sum(h, axis=-1, keepdims=True) * inv_n
    var = jnp.sum(h * h, axis=-1, keepdims=True) * inv_n - mean * mean
    return (h - mean) * lax.rsqrt(var + eps) * gamma + beta


def sentiment_kernel(
    x_ref,
    wqkv_ref, bqkv_ref,
    g1_ref, be1_ref,
    w1_ref, b1_ref, w2_ref, b2_ref,
    g2_ref, be2_ref,
    wf_ref, bf_ref,
    out_ref,
    *, embed_size, seq_len,
):
    tb, s_pad, e_pad = x_ref.shape
    rows = tb * s_pad
    # Merge (TB, S) so every dense matmul sees M = TB*S rows on the MXU.
    x2 = x_ref[...].reshape(rows, e_pad)            # f32 (residual path)
    x2_bf = x2.astype(jnp.bfloat16)                 # MXU operand

    inv_sqrt_e = jnp.float32(1.0 / (float(embed_size) ** 0.5))

    # ---- fused Q|K|V projection: one weight push, one MXU pass (weights already bf16) ----
    qkv = jnp.dot(x2_bf, wqkv_ref[...], preferred_element_type=jnp.float32) + bqkv_ref[...]
    q = qkv[:, :e_pad] * inv_sqrt_e                 # fold 1/sqrt(E) into Q once
    k = qkv[:, e_pad:2 * e_pad]
    v = qkv[:, 2 * e_pad:]

    qb = q.astype(jnp.bfloat16).reshape(tb, s_pad, e_pad)
    kb = k.astype(jnp.bfloat16).reshape(tb, s_pad, e_pad)
    vb = v.astype(jnp.bfloat16).reshape(tb, s_pad, e_pad)

    # Contract on the last dims (no explicit K transpose / XLU pass).
    scores = jnp.einsum("bqd,bkd->bqk", qb, kb, preferred_element_type=jnp.float32)
    if seq_len != s_pad:
        # Padded key positions must not receive attention mass.
        key_idx = lax.broadcasted_iota(jnp.int32, scores.shape, 2)
        scores = jnp.where(key_idx < seq_len, scores, jnp.float32(-1e30))
    scores = scores - jnp.max(scores, axis=-1, keepdims=True)
    exp_s = jnp.exp(scores)
    denom = jnp.sum(exp_s, axis=-1, keepdims=True)
    attn = exp_s * pl.reciprocal(denom, approx=True)          # EUP vrcp; VALU stays free
    attn_out = jnp.einsum("bqk,bkd->bqd", attn.astype(jnp.bfloat16), vb,
                          preferred_element_type=jnp.float32)
    # TODO(synk): for S >= 512, replace the resident (TB,S,S) scores with a KV-block
    # online-softmax (flash) loop; the 3-D output layout already allows TB < 8 there.

    # ---- residual + LN1 ----
    h1 = _layer_norm(attn_out.reshape(rows, e_pad) + x2,
                     g1_ref[...], be1_ref[...], n_real=embed_size)

    # ---- feed-forward (E -> 4E -> ReLU -> E), bf16 operands / f32 accumulate ----
    ff = jnp.dot(h1.astype(jnp.bfloat16), w1_ref[...],
                 preferred_element_type=jnp.float32) + b1_ref[...]
    ff = jnp.maximum(ff, 0.0)
    ff = jnp.dot(ff.astype(jnp.bfloat16), w2_ref[...],
                 preferred_element_type=jnp.float32) + b2_ref[...]

    # ---- residual + LN2 ----
    h2 = _layer_norm(ff + h1, g2_ref[...], be2_ref[...], n_real=embed_size)

    # ---- max-pool over sequence (F.max_pool1d with kernel_size=S) ----
    h2b = h2.reshape(tb, s_pad, e_pad)
    if seq_len != s_pad:
        row_idx = lax.broadcasted_iota(jnp.int32, h2b.shape, 1)
        h2b = jnp.where(row_idx < seq_len, h2b, jnp.float32(-1e30))
    pooled = jnp.max(h2b, axis=1)                              # (TB, E_pad)

    # ---- classifier head (lane-dense padded C, unmasked store) ----
    logits = jnp.dot(pooled.astype(jnp.bfloat16), wf_ref[...],
                     preferred_element_type=jnp.float32) + bf_ref[...]
    out_ref[...] = logits[None, :, :]                          # (1, TB, C_pad) block


def _pad_to(a, shape):
    return jnp.pad(a, tuple((0, t - s) for s, t in zip(a.shape, shape)))


def _vmem_limit_bytes():
    # v7x: 64 MiB physical -> ~48 MiB budget; v5e/v6e: 128 MiB -> ~96 MiB.
    try:
        cap = int(pltpu.get_tpu_info().vmem_capacity_bytes)
    except Exception:
        cap = 64 * 1024 * 1024
    return min((cap * 3) // 4, 112 * 1024 * 1024)


def sentiment_classifier(x, params, *, batch_tile=None):
    """x: (B, S, E) float32.  params: dict of f32 weights (see init_params)."""
    B, S, E = x.shape
    C = params["wf"].shape[1]
    H = params["w1"].shape[1]

    # Hardware-aligned padding: S to the sublane multiple (8) so (TB,S,E)<->(TB*S,E)
    # reshapes are layout no-ops; E/H/C to lane multiples (128) for full MXU/VPU width.
    S_pad = -(-S // _SUBLANES) * _SUBLANES
    E_pad = -(-E // _LANES) * _LANES
    H_pad = -(-H // _LANES) * _LANES
    C_pad = -(-C // _LANES) * _LANES

    f32, bf16 = jnp.float32, jnp.bfloat16
    # Fused QKV weight (E_pad, 3*E_pad); weights bf16 (half DMA/VMEM), biases/LN params f32.
    wqkv = jnp.concatenate(
        [_pad_to(params[n], (E_pad, E_pad)) for n in ("wq", "wk", "wv")], axis=1
    ).astype(bf16)
    bqkv = jnp.concatenate(
        [_pad_to(params[n], (1, E_pad)) for n in ("bq", "bk", "bv")], axis=1
    ).astype(f32)
    w1 = _pad_to(params["w1"], (E_pad, H_pad)).astype(bf16)
    b1 = _pad_to(params["b1"], (1, H_pad)).astype(f32)
    w2 = _pad_to(params["w2"], (H_pad, E_pad)).astype(bf16)
    b2 = _pad_to(params["b2"], (1, E_pad)).astype(f32)
    wf = _pad_to(params["wf"], (E_pad, C_pad)).astype(bf16)
    bf = _pad_to(params["bf"], (1, C_pad)).astype(f32)
    g1 = _pad_to(params["g1"], (1, E_pad))
    be1 = _pad_to(params["be1"], (1, E_pad))
    g2 = _pad_to(params["g2"], (1, E_pad))
    be2 = _pad_to(params["be2"], (1, E_pad))

    vmem_limit = _vmem_limit_bytes()

    # Batch tile: aim for TB*S_pad ~= 512 MXU rows per grid step, bounded by VMEM.
    if batch_tile is None:
        batch_tile = max(1, _ROW_TARGET // S_pad)
    tb = max(1, min(int(batch_tile), B))
    if B > 1:
        # Keep >= 2 grid steps so the "parallel" batch axis can shard across v7x's two
        # TensorCores (constant-index weight blocks are not re-fetched, so this is cheap).
        tb = min(tb, -(-B // 2))

    weight_bytes = 2 * E_pad * (3 * E_pad + 2 * H_pad + C_pad) + 4 * (9 * E_pad + H_pad + C_pad)
    act_budget = max(vmem_limit - 2 * weight_bytes, vmem_limit // 4)

    def act_bytes(t):  # resident f32 activations per step (scores dominate at large S)
        rows = t * S_pad
        return 4 * (3 * t * S_pad * S_pad + rows * (3 * E_pad + H_pad) + 4 * rows * E_pad)

    while tb > 1 and act_bytes(tb) > act_budget:
        tb //= 2

    B_pad = -(-B // tb) * tb
    n_steps = B_pad // tb
    if B_pad != B:
        x = jnp.pad(x, ((0, B_pad - B), (0, 0), (0, 0)))       # zero rows, sliced off below
    x = _pad_to(x, (B_pad, S_pad, E_pad))

    def const_spec(shape):
        # Same block every grid step -> single-buffer: no overlap to gain, halves VMEM.
        nd = len(shape)
        return pl.BlockSpec(shape, lambda b, _nd=nd: (0,) * _nd,
                            pipeline_mode=pl.Buffered(1))

    in_specs = [
        pl.BlockSpec((tb, S_pad, E_pad), lambda b: (b, 0, 0)),       # x (double-buffered)
        const_spec((E_pad, 3 * E_pad)), const_spec((1, 3 * E_pad)),  # fused QKV W, b
        const_spec((1, E_pad)), const_spec((1, E_pad)),              # ln1 gamma, beta
        const_spec((E_pad, H_pad)), const_spec((1, H_pad)),          # ff W1, b1
        const_spec((H_pad, E_pad)), const_spec((1, E_pad)),          # ff W2, b2
        const_spec((1, E_pad)), const_spec((1, E_pad)),              # ln2 gamma, beta
        const_spec((E_pad, C_pad)), const_spec((1, C_pad)),          # head Wf, bf
    ]
    # 3-D output block (1, TB, C_pad): last two dims equal the full array dims, so the
    # (8,128) rule holds even when TB < 8, and the store stays lane-dense.
    out_specs = pl.BlockSpec((1, tb, C_pad), lambda b: (b, 0, 0))

    flops_per_batch = (
        2 * S_pad * E_pad * 3 * E_pad        # fused QKV projection
        + 2 * 2 * S_pad * S_pad * E_pad      # scores + attn @ V
        + 2 * 2 * S_pad * E_pad * H_pad      # FF up + down
        + 2 * E_pad * C_pad                  # head
    )
    cost = pl.CostEstimate(
        flops=int(B_pad * flops_per_batch),
        transcendentals=int(B_pad * S_pad * (S_pad + 4)),
        bytes_accessed=int(4 * B_pad * S_pad * E_pad + n_steps * weight_bytes
                           + 4 * B_pad * C_pad),
    )

    kernel = functools.partial(sentiment_kernel, embed_size=E, seq_len=S)

    out = pl.pallas_call(
        kernel,
        out_shape=jax.ShapeDtypeStruct((n_steps, tb, C_pad), jnp.float32),
        grid_spec=pltpu.PrefetchScalarGridSpec(
            num_scalar_prefetch=0,
            grid=(n_steps,),
            in_specs=in_specs,
            out_specs=out_specs,
        ),
        compiler_params=pltpu.CompilerParams(
            dimension_semantics=("parallel",),
            vmem_limit_bytes=int(vmem_limit),
        ),
        cost_estimate=cost,
    )(
        x,
        wqkv, bqkv,
        g1, be1,
        w1, b1, w2, b2,
        g2, be2,
        wf, bf,
    )
    return out.reshape(B_pad, C_pad)[:B, :C]


def init_params(key, embed_size, num_classes, forward_expansion=4):
    E, C, H = embed_size, num_classes, forward_expansion * embed_size
    keys = jax.random.split(key, 10)

    def lin(k, fan_in, fan_out):
        # deterministic small-scale init; stored as (in, out)
        scale = 1.0 / jnp.sqrt(jnp.float32(fan_in))
        kw, kb = jax.random.split(k)
        w = jax.random.uniform(kw, (fan_in, fan_out), jnp.float32, -scale, scale)
        b = jax.random.uniform(kb, (1, fan_out), jnp.float32, -scale, scale)
        return w, b

    wq, bq = lin(keys[0], E, E)
    wk, bk = lin(keys[1], E, E)
    wv, bv = lin(keys[2], E, E)
    w1, b1 = lin(keys[3], E, H)
    w2, b2 = lin(keys[4], H, E)
    wf, bf = lin(keys[5], E, C)
    return dict(
        wq=wq, bq=bq, wk=wk, bk=bk, wv=wv, bv=bv,
        g1=jnp.ones((1, E), jnp.float32), be1=jnp.zeros((1, E), jnp.float32),
        w1=w1, b1=b1, w2=w2, b2=b2,
        g2=jnp.ones((1, E), jnp.float32), be2=jnp.zeros((1, E), jnp.float32),
        wf=wf, bf=bf,
    )


def reference_forward(x, p):
    """Pure-JAX f32 reference mirroring the PyTorch forward exactly."""
    E = x.shape[-1]
    q = x @ p["wq"] + p["bq"]
    k = x @ p["wk"] + p["bk"]
    v = x @ p["wv"] + p["bv"]
    scores = jnp.einsum("bqe,bke->bqk", q, k) / jnp.sqrt(jnp.float32(E))
    attn = jax.nn.softmax(scores, axis=-1)
    attn_out = jnp.einsum("bqk,bke->bqe", attn, v)

    def ln(h, g, b, eps=1e-5):
        m = jnp.mean(h, axis=-1, keepdims=True)
        var = jnp.mean((h - m) ** 2, axis=-1, keepdims=True)
        return (h - m) / jnp.sqrt(var + eps) * g + b

    h1 = ln(attn_out + x, p["g1"], p["be1"])
    ff = jnp.maximum(h1 @ p["w1"] + p["b1"], 0.0) @ p["w2"] + p["b2"]
    h2 = ln(ff + h1, p["g2"], p["be2"])
    pooled = jnp.max(h2, axis=1)
    return pooled @ p["wf"] + p["bf"]


if __name__ == "__main__":
    B, S, E, C = 2, 8, 32, 4
    key = jax.random.PRNGKey(0)
    kx, kp = jax.random.split(key)
    x = jax.random.normal(kx, (B, S, E), jnp.float32)
    params = init_params(kp, E, C)

    out = jax.block_until_ready(sentiment_classifier(x, params))
    ref = reference_forward(x, params)

    assert out.shape == (B, C), out.shape
    # bf16 MXU operands + approx softmax reciprocal introduce small drift vs the f32 ref.
    assert jnp.allclose(out, ref, atol=5e-2, rtol=5e-2), (out, ref)
    print("KERNEL_OK")
</pallas_src>

<mosaic_0001>
module attributes {stable_mosaic.version = 11 : i64} {
  func.func @sentiment_kernel(%arg0: i32, %arg1: memref<1x8x128xf32, #tpu.memory_space<vmem>>, %arg2: memref<128x384xbf16, #tpu.memory_space<vmem>>, %arg3: memref<1x384xf32, #tpu.memory_space<vmem>>, %arg4: memref<1x128xf32, #tpu.memory_space<vmem>>, %arg5: memref<1x128xf32, #tpu.memory_space<vmem>>, %arg6: memref<128x128xbf16, #tpu.memory_space<vmem>>, %arg7: memref<1x128xf32, #tpu.memory_space<vmem>>, %arg8: memref<128x128xbf16, #tpu.memory_space<vmem>>, %arg9: memref<1x128xf32, #tpu.memory_space<vmem>>, %arg10: memref<1x128xf32, #tpu.memory_space<vmem>>, %arg11: memref<1x128xf32, #tpu.memory_space<vmem>>, %arg12: memref<128x128xbf16, #tpu.memory_space<vmem>>, %arg13: memref<1x128xf32, #tpu.memory_space<vmem>>, %arg14: memref<1x1x128xf32, #tpu.memory_space<vmem>>) attributes {dimension_semantics = [#tpu.dimension_semantics<parallel>], iteration_bounds = array<i64: 2>, scalar_prefetch = 0 : i64, scratch_operands = 0 : i64, tpu.core_type = #tpu.core_type<tc>, window_params = [{transform_indices = @transform_0, window_bounds = array<i64: 1, 8, 128>}, {pipeline_mode = #tpu.pipeline_mode<synchronous>, transform_indices = @transform_1, window_bounds = array<i64: 128, 384>}, {pipeline_mode = #tpu.pipeline_mode<synchronous>, transform_indices = @transform_2, window_bounds = array<i64: 1, 384>}, {pipeline_mode = #tpu.pipeline_mode<synchronous>, transform_indices = @transform_3, window_bounds = array<i64: 1, 128>}, {pipeline_mode = #tpu.pipeline_mode<synchronous>, transform_indices = @transform_4, window_bounds = array<i64: 1, 128>}, {pipeline_mode = #tpu.pipeline_mode<synchronous>, transform_indices = @transform_5, window_bounds = array<i64: 128, 128>}, {pipeline_mode = #tpu.pipeline_mode<synchronous>, transform_indices = @transform_6, window_bounds = array<i64: 1, 128>}, {pipeline_mode = #tpu.pipeline_mode<synchronous>, transform_indices = @transform_7, window_bounds = array<i64: 128, 128>}, {pipeline_mode = #tpu.pipeline_mode<synchronous>, transform_indices = @transform_8, window_bounds = array<i64: 1, 128>}, {pipeline_mode = #tpu.pipeline_mode<synchronous>, transform_indices = @transform_9, window_bounds = array<i64: 1, 128>}, {pipeline_mode = #tpu.pipeline_mode<synchronous>, transform_indices = @transform_10, window_bounds = array<i64: 1, 128>}, {pipeline_mode = #tpu.pipeline_mode<synchronous>, transform_indices = @transform_11, window_bounds = array<i64: 128, 128>}, {pipeline_mode = #tpu.pipeline_mode<synchronous>, transform_indices = @transform_12, window_bounds = array<i64: 1, 128>}, {transform_indices = @transform_13, window_bounds = array<i64: 1, 1, 128>}]} {
    %c0 = arith.constant 0 : index
    %c0_0 = arith.constant 0 : index
    %c0_1 = arith.constant 0 : index
    %0 = vector.load %arg1[%c0, %c0_0, %c0_1] : memref<1x8x128xf32, #tpu.memory_space<vmem>>, vector<1x8x128xf32>
    %1 = vector.shape_cast %0 : vector<1x8x128xf32> to vector<8x128xf32>
    %2 = arith.truncf %1 : vector<8x128xf32> to vector<8x128xbf16>
    %c0_2 = arith.constant 0 : index
    %c0_3 = arith.constant 0 : index
    %3 = vector.load %arg2[%c0_2, %c0_3] : memref<128x384xbf16, #tpu.memory_space<vmem>>, vector<128x384xbf16>
    %cst = arith.constant dense<0.000000e+00> : vector<8x384xf32>
    %4 = tpu.matmul %2, %3, %cst {dimension_numbers = #tpu.dot_dimension_numbers<[1], [0], [0], [1], [0, 0, 1, 1], [], []>} : vector<8x128xbf16>, vector<128x384xbf16>, vector<8x384xf32> -> vector<8x384xf32>
    %c0_4 = arith.constant 0 : index
    %c0_5 = arith.constant 0 : index
    %5 = vector.load %arg3[%c0_4, %c0_5] : memref<1x384xf32, #tpu.memory_space<vmem>>, vector<1x384xf32>
    %6 = vector.broadcast %5 : vector<1x384xf32> to vector<8x384xf32>
    %7 = arith.addf %4, %6 : vector<8x384xf32>
    %8 = vector.extract_strided_slice %7 {offsets = [0, 0], sizes = [8, 128], strides = [1, 1]} : vector<8x384xf32> to vector<8x128xf32>
    %cst_6 = arith.constant 0.176776692 : f32
    %9 = vector.broadcast %cst_6 : f32 to vector<8x128xf32>
    %10 = arith.mulf %8, %9 : vector<8x128xf32>
    %11 = vector.extract_strided_slice %7 {offsets = [0, 128], sizes = [8, 128], strides = [1, 1]} : vector<8x384xf32> to vector<8x128xf32>
    %12 = vector.extract_strided_slice %7 {offsets = [0, 256], sizes = [8, 128], strides = [1, 1]} : vector<8x384xf32> to vector<8x128xf32>
    %13 = arith.truncf %10 : vector<8x128xf32> to vector<8x128xbf16>
    %14 = vector.shape_cast %13 : vector<8x128xbf16> to vector<1x8x128xbf16>
    %15 = arith.truncf %11 : vector<8x128xf32> to vector<8x128xbf16>
    %16 = vector.shape_cast %15 : vector<8x128xbf16> to vector<1x8x128xbf16>
    %17 = arith.truncf %12 : vector<8x128xf32> to vector<8x128xbf16>
    %18 = vector.shape_cast %17 : vector<8x128xbf16> to vector<1x8x128xbf16>
    "tpu.trace_start"() <{level = 10 : i32, message = "bqd,bkd->bqk"}> : () -> ()
    %cst_7 = arith.constant dense<0.000000e+00> : vector<1x8x8xf32>
    %19 = tpu.matmul %14, %16, %cst_7 {dimension_numbers = #tpu.dot_dimension_numbers<[2], [2], [1], [1], [0, 0, 0, 1, 1, 1], [0], [0]>} : vector<1x8x128xbf16>, vector<1x8x128xbf16>, vector<1x8x8xf32> -> vector<1x8x8xf32>
    "tpu.trace_stop"() : () -> ()
    %cst_8 = arith.constant dense<0xFF800000> : vector<1x8xf32>
    %20 = vector.multi_reduction <maximumf>, %19, %cst_8 [2] : vector<1x8x8xf32> to vector<1x8xf32>
    %21 = vector.shape_cast %20 : vector<1x8xf32> to vector<1x8x1xf32>
    %22 = vector.broadcast %21 : vector<1x8x1xf32> to vector<1x8x8xf32>
    %23 = arith.subf %19, %22 : vector<1x8x8xf32>
    %24 = math.exp %23 : vector<1x8x8xf32>
    %cst_9 = arith.constant dense<0.000000e+00> : vector<1x8xf32>
    %25 = vector.multi_reduction <add>, %24, %cst_9 [2] : vector<1x8x8xf32> to vector<1x8xf32>
    %26 = vector.shape_cast %25 : vector<1x8xf32> to vector<1x8x1xf32>
    %27 = tpu.reciprocal %26 {approx = true} : vector<1x8x1xf32> -> vector<1x8x1xf32>
    %28 = vector.broadcast %27 : vector<1x8x1xf32> to vector<1x8x8xf32>
    %29 = arith.mulf %24, %28 : vector<1x8x8xf32>
    %30 = arith.truncf %29 : vector<1x8x8xf32> to vector<1x8x8xbf16>
    "tpu.trace_start"() <{level = 10 : i32, message = "bqk,bkd->bqd"}> : () -> ()
    %cst_10 = arith.constant dense<0.000000e+00> : vector<1x8x128xf32>
    %31 = tpu.matmul %30, %18, %cst_10 {dimension_numbers = #tpu.dot_dimension_numbers<[2], [1], [1], [2], [0, 0, 0, 1, 1, 2], [0], [0]>} : vector<1x8x8xbf16>, vector<1x8x128xbf16>, vector<1x8x128xf32> -> vector<1x8x128xf32>
    "tpu.trace_stop"() : () -> ()
    %32 = vector.shape_cast %31 : vector<1x8x128xf32> to vector<8x128xf32>
    %33 = arith.addf %32, %1 : vector<8x128xf32>
    %c0_11 = arith.constant 0 : index
    %c0_12 = arith.constant 0 : index
    %34 = vector.load %arg4[%c0_11, %c0_12] : memref<1x128xf32, #tpu.memory_space<vmem>>, vector<1x128xf32>
    %c0_13 = arith.constant 0 : index
    %c0_14 = arith.constant 0 : index
    %35 = vector.load %arg5[%c0_13, %c0_14] : memref<1x128xf32, #tpu.memory_space<vmem>>, vector<1x128xf32>
    %cst_15 = arith.constant dense<0.000000e+00> : vector<8xf32>
    %36 = vector.multi_reduction <add>, %33, %cst_15 [1] : vector<8x128xf32> to vector<8xf32>
    %37 = vector.shape_cast %36 : vector<8xf32> to vector<8x1xf32>
    %cst_16 = arith.constant 3.125000e-02 : f32
    %38 = vector.broadcast %cst_16 : f32 to vector<8x1xf32>
    %39 = arith.mulf %37, %38 : vector<8x1xf32>
    %40 = arith.mulf %33, %33 : vector<8x128xf32>
    %cst_17 = arith.constant dense<0.000000e+00> : vector<8xf32>
    %41 = vector.multi_reduction <add>, %40, %cst_17 [1] : vector<8x128xf32> to vector<8xf32>
    %42 = vector.shape_cast %41 : vector<8xf32> to vector<8x1xf32>
    %cst_18 = arith.constant 3.125000e-02 : f32
    %43 = vector.broadcast %cst_18 : f32 to vector<8x1xf32>
    %44 = arith.mulf %42, %43 : vector<8x1xf32>
    %45 = arith.mulf %39, %39 : vector<8x1xf32>
    %46 = arith.subf %44, %45 : vector<8x1xf32>
    %47 = vector.broadcast %39 : vector<8x1xf32> to vector<8x128xf32>
    %48 = arith.subf %33, %47 : vector<8x128xf32>
    %cst_19 = arith.constant 9.99999974E-6 : f32
    %49 = vector.broadcast %cst_19 : f32 to vector<8x1xf32>
    %50 = arith.addf %46, %49 : vector<8x1xf32>
    %51 = math.rsqrt %50 : vector<8x1xf32>
    %52 = vector.broadcast %51 : vector<8x1xf32> to vector<8x128xf32>
    %53 = arith.mulf %48, %52 : vector<8x128xf32>
    %54 = vector.broadcast %34 : vector<1x128xf32> to vector<8x128xf32>
    %55 = arith.mulf %53, %54 : vector<8x128xf32>
    %56 = vector.broadcast %35 : vector<1x128xf32> to vector<8x128xf32>
    %57 = arith.addf %55, %56 : vector<8x128xf32>
    %58 = arith.truncf %57 : vector<8x128xf32> to vector<8x128xbf16>
    %c0_20 = arith.constant 0 : index
    %c0_21 = arith.constant 0 : index
    %59 = vector.load %arg6[%c0_20, %c0_21] : memref<128x128xbf16, #tpu.memory_space<vmem>>, vector<128x128xbf16>
    %cst_22 = arith.constant dense<0.000000e+00> : vector<8x128xf32>
    %60 = tpu.matmul %58, %59, %cst_22 {dimension_numbers = #tpu.dot_dimension_numbers<[1], [0], [0], [1], [0, 0, 1, 1], [], []>} : vector<8x128xbf16>, vector<128x128xbf16>, vector<8x128xf32> -> vector<8x128xf32>
    %c0_23 = arith.constant 0 : index
    %c0_24 = arith.constant 0 : index
    %61 = vector.load %arg7[%c0_23, %c0_24] : memref<1x128xf32, #tpu.memory_space<vmem>>, vector<1x128xf32>
    %62 = vector.broadcast %61 : vector<1x128xf32> to vector<8x128xf32>
    %63 = arith.addf %60, %62 : vector<8x128xf32>
    %cst_25 = arith.constant 0.000000e+00 : f32
    %64 = vector.broadcast %cst_25 : f32 to vector<8x128xf32>
    %65 = arith.maximumf %63, %64 : vector<8x128xf32>
    %66 = arith.truncf %65 : vector<8x128xf32> to vector<8x128xbf16>
    %c0_26 = arith.constant 0 : index
    %c0_27 = arith.constant 0 : index
    %67 = vector.load %arg8[%c0_26, %c0_27] : memref<128x128xbf16, #tpu.memory_space<vmem>>, vector<128x128xbf16>
    %cst_28 = arith.constant dense<0.000000e+00> : vector<8x128xf32>
    %68 = tpu.matmul %66, %67, %cst_28 {dimension_numbers = #tpu.dot_dimension_numbers<[1], [0], [0], [1], [0, 0, 1, 1], [], []>} : vector<8x128xbf16>, vector<128x128xbf16>, vector<8x128xf32> -> vector<8x128xf32>
    %c0_29 = arith.constant 0 : index
    %c0_30 = arith.constant 0 : index
    %69 = vector.load %arg9[%c0_29, %c0_30] : memref<1x128xf32, #tpu.memory_space<vmem>>, vector<1x128xf32>
    %70 = vector.broadcast %69 : vector<1x128xf32> to vector<8x128xf32>
    %71 = arith.addf %68, %70 : vector<8x128xf32>
    %72 = arith.addf %71, %57 : vector<8x128xf32>
    %c0_31 = arith.constant 0 : index
    %c0_32 = arith.constant 0 : index
    %73 = vector.load %arg10[%c0_31, %c0_32] : memref<1x128xf32, #tpu.memory_space<vmem>>, vector<1x128xf32>
    %c0_33 = arith.constant 0 : index
    %c0_34 = arith.constant 0 : index
    %74 = vector.load %arg11[%c0_33, %c0_34] : memref<1x128xf32, #tpu.memory_space<vmem>>, vector<1x128xf32>
    %cst_35 = arith.constant dense<0.000000e+00> : vector<8xf32>
    %75 = vector.multi_reduction <add>, %72, %cst_35 [1] : vector<8x128xf32> to vector<8xf32>
    %76 = vector.shape_cast %75 : vector<8xf32> to vector<8x1xf32>
    %cst_36 = arith.constant 3.125000e-02 : f32
    %77 = vector.broadcast %cst_36 : f32 to vector<8x1xf32>
    %78 = arith.mulf %76, %77 : vector<8x1xf32>
    %79 = arith.mulf %72, %72 : vector<8x128xf32>
    %cst_37 = arith.constant dense<0.000000e+00> : vector<8xf32>
    %80 = vector.multi_reduction <add>, %79, %cst_37 [1] : vector<8x128xf32> to vector<8xf32>
    %81 = vector.shape_cast %80 : vector<8xf32> to vector<8x1xf32>
    %cst_38 = arith.constant 3.125000e-02 : f32
    %82 = vector.broadcast %cst_38 : f32 to vector<8x1xf32>
    %83 = arith.mulf %81, %82 : vector<8x1xf32>
    %84 = arith.mulf %78, %78 : vector<8x1xf32>
    %85 = arith.subf %83, %84 : vector<8x1xf32>
    %86 = vector.broadcast %78 : vector<8x1xf32> to vector<8x128xf32>
    %87 = arith.subf %72, %86 : vector<8x128xf32>
    %cst_39 = arith.constant 9.99999974E-6 : f32
    %88 = vector.broadcast %cst_39 : f32 to vector<8x1xf32>
    %89 = arith.addf %85, %88 : vector<8x1xf32>
    %90 = math.rsqrt %89 : vector<8x1xf32>
    %91 = vector.broadcast %90 : vector<8x1xf32> to vector<8x128xf32>
    %92 = arith.mulf %87, %91 : vector<8x128xf32>
    %93 = vector.broadcast %73 : vector<1x128xf32> to vector<8x128xf32>
    %94 = arith.mulf %92, %93 : vector<8x128xf32>
    %95 = vector.broadcast %74 : vector<1x128xf32> to vector<8x128xf32>
    %96 = arith.addf %94, %95 : vector<8x128xf32>
    %97 = vector.shape_cast %96 : vector<8x128xf32> to vector<1x8x128xf32>
    %cst_40 = arith.constant dense<0xFF800000> : vector<1x128xf32>
    %98 = vector.multi_reduction <maximumf>, %97, %cst_40 [1] : vector<1x8x128xf32> to vector<1x128xf32>
    %99 = arith.truncf %98 : vector<1x128xf32> to vector<1x128xbf16>
    %c0_41 = arith.constant 0 : index
    %c0_42 = arith.constant 0 : index
    %100 = vector.load %arg12[%c0_41, %c0_42] : memref<128x128xbf16, #tpu.memory_space<vmem>>, vector<128x128xbf16>
    %cst_43 = arith.constant dense<0.000000e+00> : vector<1x128xf32>
    %101 = tpu.matmul %99, %100, %cst_43 {dimension_numbers = #tpu.dot_dimension_numbers<[1], [0], [0], [1], [0, 0, 1, 1], [], []>} : vector<1x128xbf16>, vector<128x128xbf16>, vector<1x128xf32> -> vector<1x128xf32>
    %c0_44 = arith.constant 0 : index
    %c0_45 = arith.constant 0 : index
    %102 = vector.load %arg13[%c0_44, %c0_45] : memref<1x128xf32, #tpu.memory_space<vmem>>, vector<1x128xf32>
    %103 = arith.addf %101, %102 : vector<1x128xf32>
    %104 = vector.shape_cast %103 : vector<1x128xf32> to vector<1x1x128xf32>
    %c0_46 = arith.constant 0 : index
    %c0_47 = arith.constant 0 : index
    %c0_48 = arith.constant 0 : index
    %105 = vector.load %arg14[%c0_46, %c0_47, %c0_48] : memref<1x1x128xf32, #tpu.memory_space<vmem>>, vector<1x1x128xf32>
    tpu.vector_store %arg14[%c0_46, %c0_47, %c0_48], %104 {strides = array<i32>} : memref<1x1x128xf32, #tpu.memory_space<vmem>>, vector<1x1x128xf32>,
    return
  }
  func.func @transform_0(%arg0: i32) -> (i32, i32, i32) {
    %c0_i32 = arith.constant 0 : i32
    %c0_i32_0 = arith.constant 0 : i32
    %c0_i32_1 = arith.constant 0 : i32
    return %arg0, %c0_i32, %c0_i32_0 : i32, i32, i32
  }
  func.func @transform_1(%arg0: i32) -> (i32, i32) {
    %c0_i32 = arith.constant 0 : i32
    %c0_i32_0 = arith.constant 0 : i32
    %c0_i32_1 = arith.constant 0 : i32
    return %c0_i32, %c0_i32_0 : i32, i32
  }
  func.func @transform_2(%arg0: i32) -> (i32, i32) {
    %c0_i32 = arith.constant 0 : i32
    %c0_i32_0 = arith.constant 0 : i32
    %c0_i32_1 = arith.constant 0 : i32
    return %c0_i32, %c0_i32_0 : i32, i32
  }
  func.func @transform_3(%arg0: i32) -> (i32, i32) {
    %c0_i32 = arith.constant 0 : i32
    %c0_i32_0 = arith.constant 0 : i32
    %c0_i32_1 = arith.constant 0 : i32
    return %c0_i32, %c0_i32_0 : i32, i32
  }
  func.func @transform_4(%arg0: i32) -> (i32, i32) {
    %c0_i32 = arith.constant 0 : i32
    %c0_i32_0 = arith.constant 0 : i32
    %c0_i32_1 = arith.constant 0 : i32
    return %c0_i32, %c0_i32_0 : i32, i32
  }
  func.func @transform_5(%arg0: i32) -> (i32, i32) {
    %c0_i32 = arith.constant 0 : i32
    %c0_i32_0 = arith.constant 0 : i32
    %c0_i32_1 = arith.constant 0 : i32
    return %c0_i32, %c0_i32_0 : i32, i32
  }
  func.func @transform_6(%arg0: i32) -> (i32, i32) {
    %c0_i32 = arith.constant 0 : i32
    %c0_i32_0 = arith.constant 0 : i32
    %c0_i32_1 = arith.constant 0 : i32
    return %c0_i32, %c0_i32_0 : i32, i32
  }
  func.func @transform_7(%arg0: i32) -> (i32, i32) {
    %c0_i32 = arith.constant 0 : i32
    %c0_i32_0 = arith.constant 0 : i32
    %c0_i32_1 = arith.constant 0 : i32
    return %c0_i32, %c0_i32_0 : i32, i32
  }
  func.func @transform_8(%arg0: i32) -> (i32, i32) {
    %c0_i32 = arith.constant 0 : i32
    %c0_i32_0 = arith.constant 0 : i32
    %c0_i32_1 = arith.constant 0 : i32
    return %c0_i32, %c0_i32_0 : i32, i32
  }
  func.func @transform_9(%arg0: i32) -> (i32, i32) {
    %c0_i32 = arith.constant 0 : i32
    %c0_i32_0 = arith.constant 0 : i32
    %c0_i32_1 = arith.constant 0 : i32
    return %c0_i32, %c0_i32_0 : i32, i32
  }
  func.func @transform_10(%arg0: i32) -> (i32, i32) {
    %c0_i32 = arith.constant 0 : i32
    %c0_i32_0 = arith.constant 0 : i32
    %c0_i32_1 = arith.constant 0 : i32
    return %c0_i32, %c0_i32_0 : i32, i32
  }
  func.func @transform_11(%arg0: i32) -> (i32, i32) {
    %c0_i32 = arith.constant 0 : i32
    %c0_i32_0 = arith.constant 0 : i32
    %c0_i32_1 = arith.constant 0 : i32
    return %c0_i32, %c0_i32_0 : i32, i32
  }
  func.func @transform_12(%arg0: i32) -> (i32, i32) {
    %c0_i32 = arith.constant 0 : i32
    %c0_i32_0 = arith.constant 0 : i32
    %c0_i32_1 = arith.constant 0 : i32
    return %c0_i32, %c0_i32_0 : i32, i32
  }
  func.func @transform_13(%arg0: i32) -> (i32, i32, i32) {
    %c0_i32 = arith.constant 0 : i32
    %c0_i32_0 = arith.constant 0 : i32
    %c0_i32_1 = arith.constant 0 : i32
    return %arg0, %c0_i32, %c0_i32_0 : i32, i32, i32
  }
}

</mosaic_0001>

<bundles_post_ra>
// kernel: tpu_custom_call.1
= control target key start
LH: loop header
LB: loop body
LE: loop exit
PB: predicated region body
PF: predicated region fallthrough
CT: control target
= control target key end

     0   :  { %s2423_s0 = inlined_call_operand.hbm [shape: f32[2,8,128], index: 0, kind: input, shape index: {}]   ;;  %s2424_s1 = inlined_call_operand.hbm [shape: bf16[128,384], index: 1, kind: input, shape index: {}]   ;;  %s2425_s2 = inlined_call_operand.vmem [shape: f32[1,384], index: 2, kind: input, shape index: {}]   ;;  %s2426_s3 = inlined_call_operand.vmem [shape: f32[1,128], index: 3, kind: input, shape index: {}]   ;;  %s2427_s4 = inlined_call_operand.vmem [shape: f32[1,128], index: 4, kind: input, shape index: {}]   ;;  %s2428_s5 = inlined_call_operand.hbm [shape: bf16[128,128], index: 5, kind: input, shape index: {}]   ;;  %s2429_s6 = inlined_call_operand.vmem [shape: f32[1,128], index: 6, kind: input, shape index: {}]   ;;  %s2430_s7 = inlined_call_operand.hbm [shape: bf16[128,128], index: 7, kind: input, shape index: {}]   ;;  %s2431_s8 = inlined_call_operand.vmem [shape: f32[1,128], index: 8, kind: input, shape index: {}]   ;;  %s2432_s9 = inlined_call_operand.vmem [shape: f32[1,128], index: 9, kind: input, shape index: {}]   ;;  %s2433_s10 = inlined_call_operand.vmem [shape: f32[1,128], index: 10, kind: input, shape index: {}]   ;;  %s2434_s11 = inlined_call_operand.hbm [shape: bf16[128,128], index: 11, kind: input, shape index: {}]   ;;  %s2435_s12 = inlined_call_operand.vmem [shape: f32[1,128], index: 12, kind: input, shape index: {}]   ;;  %s2436_s13 = inlined_call_operand.hbm [shape: f32[2,1,128], index: 13, kind: output, shape index: {}]  }
   0x1   :  { %2441 = sst [smem:[#allocation16_spill]] %s2424_s1 }
   0x2   :  { %2442 = sst [smem:[#allocation17_spill]] %s2431_s8 }
   0x3   :  { %2443 = sst [smem:[#allocation18_spill]] %s2432_s9 }
   0x4   :  { %2444 = sst [smem:[#allocation19_spill]] %s2433_s10 }
   0x5   :  { %2445 = sst [smem:[#allocation20_spill]] %s2435_s12 }
   0x6   :  { %2446 = sst [smem:[#allocation21_spill]] %s2436_s13 }
   0x7   :  { %18 = vsyncpa [#allocation3], 0 }
   0x8   :  { %20 = vsyncpa [#allocation3 + $0x1], 0 }
   0x9   :  { %21 = vsyncpa [#allocation6], 0 }
   0xa   :  { %22 = vsyncpa [#allocation9], 0 }
   0xb   :  { %23 = vsyncpa [#allocation4], 0 }
   0xc   :  { %25 = vsyncpa [#allocation4 + $0x1], 0  ;;  %s2056_s25 = smov 0   ;;  %s2058_s26 = smov 0  }
   0xd   :  { %s2060_s27 = smov 0   ;;  %s2062_s28 = smov 0  }
   0xe LB: > { %s1973_s29 = smov [#allocation5]   ;;  %s2077_s14 = sadd.s32 4294967295, %s1971_s28   ;;  %s1971_s28 = sphi %s2062_s28, %s2473_s28   ;;  %s1967_s27 = sphi %s2060_s27, %s2472_s27   ;;  %s1963_s26 = sphi %s2058_s26, %s2471_s26   ;;  %s1959_s25 = sphi %s2056_s25, %s2470_s25  }
   0xf   : > { %s352_s30 = sshll.u32 %s1973_s29, 4  ;;  %p1393_p0 = scmp.ge.s32.totalorder %s1971_s28, 1  ;;  %s2082_s30 = int_to_ptr.vmem [resolvable:$true] %s352_s30 }
  0x10   : > { %p2438_p1 = scmp.eq.s32.totalorder %s2077_s14, 0  ;;  %p340_p2 = scmp.lt.s32.totalorder %s1971_s28, 3 }
  0x11   : > { %s1974_s17 = smov [#allocation8]   ;;  %s1975_s19 = smov [#allocation7]  }
  0x12   : > { %p2084_p3 = pnand %p1393_p0, %p340_p2  ;;  %s390_s18 = sshll.u32 %s1974_s17, 4  ;;  %s2097_s18 = int_to_ptr.vmem [resolvable:$true] %s390_s18 }
  0x13   : > { %s2099_s20 = sshll.u32 %s1975_s19, 4  ;;  %s2449_s1 = sld [smem:[#allocation16_spill]]  ;;  %s375_s20 = int_to_ptr.vmem [resolvable:$true] %s2099_s20 }
  0x14   : > { %s2447_s15 = scalar_select %p2084_p3, 1, 0 }
  0x15   : > { %p1617_p5 = pneg %p2084_p3 }
  0x17   : > { %p2093_p6 = pnand %p1617_p5, %p2438_p1 }
  0x19   : > { %s1755_s23 = scalar_lea.hbm %s2449_s1, 3072  ;;  %p2109_p8 = pneg %p2093_p6 }
  0x1a   : > { %p1756_p7 = scmp.ne.s32.totalorder %s2449_s1, %s1755_s23  ;;  %p1762_p11 = scmp.lt.u32.totalorder %s1755_s23, %s2449_s1 }
  0x1c   : > { %p1758_p9 = pnand %p2109_p8, %p1756_p7 }
  0x1e   : > { %p1759_p10 = pneg %p1758_p9 }
  0x20   : > { %p1764_p12 = pnand %p1762_p11, %p1759_p10 }
  0x22   : > { %1767 = shalt.err (!%p1764_p12)
}
  0x23   : > { %s1768_s21 = scalar_lea.vmem %s2082_s30, 3072  ;;  %p1776_p5 = scmp.lt.s32.totalorder %s2082_s30, %s2082_s30 }
  0x24   : > { %p1769_p13 = scmp.ne.s32.totalorder %s2082_s30, %s1768_s21  ;;  %p1777_p4 = scmp.lt.s32.totalorder %s1768_s21, %s1768_s21 }
  0x26   : > { %p1771_p0 = pnand %p1769_p13, %p2109_p8  ;;  %p1778_p7 = por %p1777_p4, %p1776_p5 }
  0x28   : > { %p1772_p2 = pneg %p1771_p0 }
  0x2a   : > { %p1779_p9 = pnand %p1778_p7, %p1772_p2 }
  0x2c   : > { %1782 = shalt.err (!%p1779_p9)
}
  0x2d   : > { %s1976_s22 = smov 192   ;;  %s1977_s23 = smov 12  }
  0x2e   : > { %1620 = dma.hbm_to_vmem [thread:$0]  (!%p2093_p6), %s2449_s1, 3072, %s2082_s30, [#allocation6], %s1976_s22, %s1976_s22, %s1977_s23  }
  0x2f   : > { %s1783_s12 = scalar_lea.hbm %s2430_s7, 1024 }
  0x30   : > { %p1784_p4 = scmp.ne.s32.totalorder %s2430_s7, %s1783_s12  ;;  %p1790_p12 = scmp.lt.u32.totalorder %s1783_s12, %s2430_s7 }
  0x32   : > { %p1786_p10 = pnand %p1784_p4, %p2109_p8 }
  0x34   : > { %p1787_p11 = pneg %p1786_p10 }
  0x36   : > { %p1792_p13 = pnand %p1790_p12, %p1787_p11 }
  0x38   : > { %1795 = shalt.err (!%p1792_p13)
}
  0x39   : > { %s1796_s30 = scalar_lea.vmem %s2097_s18, 1024  ;;  %p1804_p7 = scmp.lt.s32.totalorder %s2097_s18, %s2097_s18 }
  0x3a   : > { %p1797_p0 = scmp.ne.s32.totalorder %s2097_s18, %s1796_s30  ;;  %p1805_p9 = scmp.lt.s32.totalorder %s1796_s30, %s1796_s30 }
  0x3c   : > { %p1799_p2 = pnand %p1797_p0, %p2109_p8  ;;  %p1806_p4 = por %p1805_p9, %p1804_p7 }
  0x3e   : > { %p1800_p5 = pneg %p1799_p2 }
  0x40   : > { %p1807_p10 = pnand %p1806_p4, %p1800_p5 }
  0x42   : > { %1810 = shalt.err (!%p1807_p10)
}
  0x43   : > { %s1978_s9 = smov 64   ;;  %s1979_s8 = smov 4  }
  0x44   : > { %1626 = dma.hbm_to_vmem [thread:$0]  (!%p2093_p6), %s2430_s7, 1024, %s2097_s18, [#allocation9], %s1978_s9, %s1978_s9, %s1979_s8  }
  0x45   : > { %s1811_s24 = scalar_lea.hbm %s2428_s5, 1024 }
  0x46   : > { %p1812_p11 = scmp.ne.s32.totalorder %s2428_s5, %s1811_s24  ;;  %p1818_p0 = scmp.lt.u32.totalorder %s1811_s24, %s2428_s5 }
  0x48   : > { %p1814_p12 = pnand %p1812_p11, %p2109_p8 }
  0x4a   : > { %p1815_p13 = pneg %p1814_p12 }
  0x4c   : > { %p1820_p2 = pnand %p1818_p0, %p1815_p13 }
  0x4e   : > { %1823 = shalt.err (!%p1820_p2)
}
  0x4f   : > { %s1824_s30 = scalar_lea.vmem %s375_s20, 1024  ;;  %p1832_p4 = scmp.lt.s32.totalorder %s375_s20, %s375_s20 }
  0x50   : > { %p1825_p5 = scmp.ne.s32.totalorder %s375_s20, %s1824_s30  ;;  %p1833_p10 = scmp.lt.s32.totalorder %s1824_s30, %s1824_s30 }
  0x52   : > { %p1827_p7 = pnand %p1825_p5, %p2109_p8  ;;  %p1834_p1 = por %p1833_p10, %p1832_p4 }
  0x54   : > { %p1828_p9 = pneg %p1827_p7 }
  0x56   : > { %p1835_p3 = pnand %p1834_p1, %p1828_p9 }
  0x58   : > { %1838 = shalt.err (!%p1835_p3)
}
  0x59   : > { %1623 = dma.hbm_to_vmem [thread:$0]  (!%p2093_p6), %s2428_s5, 1024, %s375_s20, [#allocation6], %s1978_s9, %s1978_s9, %s1979_s8  }
  0x5a   : > { %s1980_s12 = smov [#allocation10]   ;;  %s1839_s29 = scalar_lea.hbm %s2434_s11, 1024 }
  0x5b   : > { %s412_s22 = sshll.u32 %s1980_s12, 4  ;;  %p1840_p1 = scmp.ne.s32.totalorder %s2434_s11, %s1839_s29  ;;  %s413_s22 = int_to_ptr.vmem [resolvable:$true] %s412_s22 }
  0x5c   : > { %p1846_p12 = scmp.lt.u32.totalorder %s1839_s29, %s2434_s11 }
  0x5d   : > { %p1842_p3 = pnand %p1840_p1, %p2109_p8 }
  0x5f   : > { %p1843_p11 = pneg %p1842_p3 }
  0x61   : > { %p1848_p13 = pnand %p1846_p12, %p1843_p11 }
  0x63   : > { %1851 = shalt.err (!%p1848_p13)
}
  0x64   : > { %s1852_s20 = scalar_lea.vmem %s413_s22, 1024  ;;  %p1860_p7 = scmp.lt.s32.totalorder %s413_s22, %s413_s22 }
  0x65   : > { %p1853_p0 = scmp.ne.s32.totalorder %s413_s22, %s1852_s20  ;;  %p1861_p9 = scmp.lt.s32.totalorder %s1852_s20, %s1852_s20 }
  0x67   : > { %p1855_p2 = pnand %p1853_p0, %p2109_p8  ;;  %p1862_p4 = por %p1861_p9, %p1860_p7 }
  0x69   : > { %p1856_p5 = pneg %p1855_p2 }
  0x6b   : > { %p1863_p10 = pnand %p1862_p4, %p1856_p5 }
  0x6d   : > { %1866 = shalt.err (!%p1863_p10)
}
  0x6e   : > { %1629 = dma.hbm_to_vmem [thread:$0]  (!%p2093_p6), %s2434_s11, 1024, %s413_s22, [#allocation9], %s1978_s9, %s1978_s9, %s1979_s8  }
  0x6f   : > { %s1392_s13 = sadd.s32 4294967294, %s1971_s28   ;;  %s2201_s16 = sadd.s32 1, %s1971_s28  }
  0x70   : > { %s35_s12 = ssub.s32 %s1971_s28, %s2201_s16  ;;  %s38_s23 = sadd.s32 1, %s1967_s27 }
  0x71   : > { %p36_p8 = scmp.eq.s32.totalorder %s35_s12, 0  ;;  %p45_p1 = scmp.ne.s32.totalorder %s1967_s27, %s1963_s26 }
  0x72   : > { %p46_p3 = scmp.eq.s32.totalorder %s1971_s28, 0  ;;  %p51_p11 = scmp.ne.s32.totalorder %s1963_s26, %s1959_s25 }
  0x73   : > { %s2212_s24 = scalar_select %p36_p8, %s1967_s27, %s38_s23  }
  0x74   : > { %p2214_p12 = por %p46_p3, %p45_p1  ;;  %p2452_p13 = scmp.eq.s32.totalorder %s2077_s14, 0 }
  0x75   : > { %p327_p0 = scmp.eq.s32.totalorder %s2077_s14, 1  ;;  %p333_p2 = scmp.eq.s32.totalorder %s1392_s13, 1 }
  0x76   : > { %p2220_p6 = por %p2452_p13, %p51_p11  ;;  %p1642_p5 = scmp.lt.s32.totalorder %s1971_s28, 2 }
  0x77   : > { %s429_s8 = sand.u32 1, %s1967_s27   ;;  %p2227_p7 = por %p327_p0, %p45_p1 }
  0x78   : > { %p2231_p9 = por %p333_p2, %p51_p11  ;;  %s1399_s19 = sshll.u32 %s429_s8, 3 }
  0x79   : > { %s2454_s22 = scalar_select %p2227_p7, 1, 0 }
  0x7a   : > { %s2455_s17 = scalar_select %p2231_p9, 1, 0 }
  0x7b   : > { %s1400_s21 = sshll.u32 %s1971_s28, 7  ;;  %s433_s10 = scalar_lea.vmem [#allocation2], %s1399_s19 }
  0x7c   : > { %s2239_s18 = scalar_lea.hbm %s2423_s0, %s1400_s21  ;;  %s440_s13 = sshll.u32 %s433_s10, 4  ;;  %s2241_s13 = int_to_ptr.vmem [resolvable:$true] %s440_s13 }
  0x7d   : > { %p2245_p4 = pnand %p1642_p5, %p2214_p12  ;;  %s430_s23 = scalar_lea.sflag [#allocation3], %s429_s8 }
  0x7e   : > { %s1867_s1 = scalar_lea.hbm %s2239_s18, 128  ;;  %s1872_s30 = scalar_lea.hbm %s2423_s0, 256 }
  0x7f   : > { %p1868_p10 = scmp.ne.s32.totalorder %s2239_s18, %s1867_s1  ;;  %p1869_p8 = pneg %p2245_p4 }
  0x80   : > { %p1873_p11 = scmp.lt.u32.totalorder %s2239_s18, %s2423_s0  ;;  %p1874_p12 = scmp.lt.u32.totalorder %s1872_s30, %s1867_s1 }
  0x81   : > { %p1870_p1 = pnand %p1869_p8, %p1868_p10  ;;  %p1876_p0 = scmp.lt.u32.totalorder %s1867_s1, %s2239_s18 }
  0x82   : > { %p1875_p13 = por %p1874_p12, %p1873_p11 }
  0x83   : > { %p1871_p3 = pneg %p1870_p1 }
  0x84   : > { %p1877_p2 = por %p1876_p0, %p1875_p13 }
  0x86   : > { %p1878_p5 = pnand %p1877_p2, %p1871_p3 }
  0x88   : > { %1881 = shalt.err (!%p1878_p5)
}
  0x89   : > { %s1882_s8 = scalar_lea.vmem %s2241_s13, 128  ;;  %s1981_s10 = smov [#allocation2]  }
  0x8a   : > { %p1883_p10 = scmp.ne.s32.totalorder %s2241_s13, %s1882_s8  ;;  %s1887_s19 = sshll.u32 %s1981_s10, 4  ;;  %s1888_s19 = int_to_ptr.vmem [resolvable:$false] %s1887_s19 }
  0x8b   : > { %s1889_s21 = scalar_lea.vmem %s1888_s19, 256  ;;  %p1890_p7 = scmp.lt.s32.totalorder %s2241_s13, %s1888_s19 }
  0x8c   : > { %p1885_p1 = pnand %p1883_p10, %p1869_p8  ;;  %p1891_p11 = scmp.lt.s32.totalorder %s1889_s21, %s1882_s8 }
  0x8e   : > { %p1886_p9 = pneg %p1885_p1  ;;  %p1892_p12 = por %p1891_p11, %p1890_p7 }
  0x90   : > { %p1893_p13 = pnand %p1892_p12, %p1886_p9 }
  0x92   : > { %1896 = shalt.err (!%p1893_p13)
}
  0x93   : > { %1633 = dma.hbm_to_vmem [thread:$0]  (!%p2245_p4), %s2239_s18, 128, %s2241_s13, %s430_s23  }
  0x94   : > { %p2457_p3 = scmp.ne.s32.totalorder %s2447_s15, 0 }
  0x95   : > { %s2277_s1 = sand.u32 (!%p2457_p3), 1, %s1963_s26  }
  0x96   : > { %449 = sbr.rel (%p2457_p3) target bundleno = 2178 (0x882), region = 72  ;;  %s1402_s30 = sshll.u32 (!%p2457_p3), %s2277_s1, 3 }
  0x97   : > { %s452_s29 = scalar_lea.sflag (!%p2457_p3), [#allocation3], %s2277_s1  ;;  %s2281_s20 = scalar_lea.vmem (!%p2457_p3), [#allocation2], %s1402_s30 }
  0x9d   : > { %1942 = dma.done.wait (%p2220_p6), %s452_s29, 128  }
  0x9e   : > { %1944 = vsyncadd (%p2220_p6), %s452_s29, 4294967168  ;;  %p2458_p7 = scmp.eq.s32.totalorder %s2077_s14, 0 }
  0xa0   : > { %1946 = dma.done.wait (%p2458_p7), [#allocation6], 4096   ;;  %p2459_p9 = pmov %p2458_p7 }
  0xa1   : > { %p2460_p4 = pmov %p2458_p7 }
  0xa2   : > { %1948 = vsyncadd (%p2459_p9), [#allocation6], 4294963200 }
  0xa3   : > { %1950 = dma.done.wait (%p2460_p4), [#allocation9], 2048   ;;  %p2461_p8 = pmov %p2460_p4 }
  0xa4   : > { %v1982_v0 = vmov 0   ;;  %v1983_v1 = vmov 0.0   ;;  %v1691_v2 = vld [vmem:[#allocation5 + $0x4] ss:$12 sps:$4 sm:$0xff]   ;;  %v1693_v3 = vld [vmem:[#allocation5] ss:$12 sps:$4 sm:$0xff]   ;;  %v550_v28 = vlaneseq }
  0xa5   : > { %1952 = vsyncadd (%p2461_p8), [#allocation9], 4294965248  ;;  %725 = vmatprep.mubr.bf16.mxu0 %v1982_v0  ;;  %1505 = vmatprep.subr.bf16.mxu1 %v1983_v1  ;;  %v1694_v4 = vld [vmem:[#allocation5 + $0x1c] ss:$12 sps:$4 sm:$0xff]   ;;  %v1696_v5 = vld [vmem:[#allocation5 + $0x18] ss:$12 sps:$4 sm:$0xff]  }
  0xa6   : > { %693 = vmatprep.subr.bf16.mxu0 %v1691_v2  ;;  %v1697_v6 = vld [vmem:[#allocation5 + $0x34] ss:$12 sps:$4 sm:$0xff]   ;;  %v1699_v7 = vld [vmem:[#allocation5 + $0x30] ss:$12 sps:$4 sm:$0xff]   ;;  %v1700_v8 = vld [vmem:[#allocation5 + $0x4c] ss:$12 sps:$4 sm:$0xff]  }
  0xa7   : > { %694 = vmatpush1.bf16.msra.mxu0 %v1693_v3  ;;  %v1702_v9 = vld [vmem:[#allocation5 + $0x48] ss:$12 sps:$4 sm:$0xff]   ;;  %v1703_v11 = vld [vmem:[#allocation5 + $0x64] ss:$12 sps:$4 sm:$0xff]   ;;  %v1716_v12 = vld [vmem:[#allocation5 + $0x20] ss:$12 sps:$4 sm:$0xff]  }
  0xa8   : > { %695 = vmatprep.subr.bf16.mxu0 %v1694_v4  ;;  %v1715_v10 = vld [vmem:[#allocation5 + $0x8] ss:$12 sps:$4 sm:$0xff]   ;;  %v1705_v13 = vld [vmem:[#allocation5 + $0x60] ss:$12 sps:$4 sm:$0xff]   ;;  %v1708_v15 = vld [vmem:[#allocation5 + $0x78] ss:$12 sps:$4 sm:$0xff]  }
  0xa9   : > { %1506 = vmatpush3.bf16.msra.mxu1 %v1715_v10  ;;  %v1706_v14 = vld [vmem:[#allocation5 + $0x7c] ss:$12 sps:$4 sm:$0xff]   ;;  %v1717_v16 = vld [vmem:[#allocation5 + $0x38] ss:$12 sps:$4 sm:$0xff]   ;;  %v1709_v17 = vld [vmem:[#allocation5 + $0x94] ss:$12 sps:$4 sm:$0xff]  }
  0xaa   : > { %1507 = vmatprep.subr.bf16.mxu1 %v1983_v1  ;;  %v1718_v18 = vld [vmem:[#allocation5 + $0x50] ss:$12 sps:$4 sm:$0xff]   ;;  %v1712_v20 = vld [vmem:[#allocation5 + $0xac] ss:$12 sps:$4 sm:$0xff]   ;;  %v1719_v21 = vld [vmem:[#allocation5 + $0x68] ss:$12 sps:$4 sm:$0xff]  }
  0xab   : > { %696 = vmatpush1.bf16.msra.mxu0 %v1696_v5  ;;  %v1711_v19 = vld [vmem:[#allocation5 + $0x90] ss:$12 sps:$4 sm:$0xff]   ;;  %v1714_v22 = vld [vmem:[#allocation5 + $0xa8] ss:$12 sps:$4 sm:$0xff]   ;;  %v1720_v24 = vld [vmem:[#allocation5 + $0x80] ss:$12 sps:$4 sm:$0xff]  }
  0xac   : > { %697 = vmatprep.subr.bf16.mxu0 %v1697_v6  ;;  %v2300_v23 = vld [vmem:[%s2281_s20] sm:$0xff]  ;;  %vm1984_vm0 = vmmov 0   ;;  %v551_v29 = vshrl.u32 %v550_v28, 7  ;;  %vm834_vm1 = vcmask 1043456   ;;  %vm818_vm2 = vcmask 64512   ;;  %v1723_v4 = vld [vmem:[#allocation7] sm:$0xff]  }
  0xad   : > { %1508 = vmatpush3.bf16.msra.mxu1 %v1716_v12  ;;  %v515_v25 = vpack.c.bf16 %v2300_v23, %v2300_v23  ;;  %v1721_v26 = vld [vmem:[#allocation5 + $0x98] ss:$12 sps:$4 sm:$0xff]   ;;  %v1722_v27 = vld [vmem:[#allocation5 + $0xb0] ss:$12 sps:$4 sm:$0xff]   ;;  %1521 = vmatprep.mubr.msk.bf16.mxu1 %vm1984_vm0, %v1983_v1  ;;  %s2462_s30 = sld [smem:[#allocation17_spill]]  ;;  %s2463_s15 = sld [smem:[#allocation18_spill]] }
  0xae   : > { %1509 = vmatprep.subr.bf16.mxu1 %v1983_v1  ;;  %v556_v30 = vsub.s32 1, %v551_v29  ;;  %v548_v31 = vld [vmem:[%s2425_s2] sm:$0x7]  ;;  %v552_v32 = vsub.s32 0, %v551_v29  ;;  %v560_v44 = vsub.s32 2, %v551_v29  ;;  %s2464_s13 = sld [smem:[#allocation19_spill]] }
  0xaf   : > { %698 = vmatpush1.bf16.msra.mxu0 %v1699_v7  ;;  %v1725_v12 = vld [vmem:[#allocation7 + $0x10] sm:$0xff]   ;;  %s2465_s8 = sld [smem:[#allocation20_spill]]  ;;  %s1462_s10 = sshll.u32 %s2077_s14, 4 }
  0xb0   : > { %699 = vmatprep.subr.bf16.mxu0 %v1700_v8  ;;  %v557_v33 = vrot.slane %v548_v31, %v556_v30  ;;  %v553_v34 = vrot.slane %v548_v31, %v552_v32  ;;  %v561_v45 = vrot.slane %v548_v31, %v560_v44  ;;  %s512_s19 = scalar_lea.vmem [#allocation11], %s2277_s1  ;;  %s2466_s20 = sld [smem:[#allocation21_spill]] }
  0xb1   : > { %1510 = vmatpush3.bf16.msra.mxu1 %v1717_v16  ;;  %v1729_v16 = vld [vmem:[#allocation7 + $0x30] sm:$0xff]   ;;  %s1288_s21 = sshll.u32 %s512_s19, 4  ;;  %s1276_s9 = scalar_lea.sflag [#allocation4], %s2277_s1  ;;  %s2381_s21 = int_to_ptr.vmem [resolvable:$true] %s1288_s21 }
  0xb2   : > { %1511 = vmatprep.subr.bf16.mxu1 %v1983_v1  ;;  %s1897_s14 = scalar_lea.vmem %s2381_s21, 16  ;;  %p2467_p0 = scmp.ne.s32.totalorder %s2454_s22, 0 }
  0xb3   : > { %700 = vmatpush1.bf16.msra.mxu0 %v1702_v9  ;;  %p1898_p6 = scmp.ne.s32.totalorder %s2381_s21, %s1897_s14  ;;  %s1985_s18 = smov [#allocation11]  }
  0xb4   : > { %701 = vmatprep.subr.bf16.mxu0 %v1703_v11  ;;  %v1724_v11 = vld [vmem:[#allocation7 + $0x8] sm:$0xff]  }
  0xb5   : > { %1512 = vmatpush3.bf16.msra.mxu1 %v1718_v18  ;;  %v1731_v18 = vld [vmem:[#allocation8] sm:$0xff]   ;;  %p1899_p2 = pnand %p1898_p6, %p2467_p0 }
  0xb6   : > { %1513 = vmatprep.subr.bf16.mxu1 %v1983_v1 }
  0xb7   : > { %702 = vmatpush1.bf16.msra.mxu0 %v1705_v13  ;;  %v1726_v13 = vld [vmem:[#allocation7 + $0x18] sm:$0xff]   ;;  %p1900_p5 = pneg %p1899_p2 }
  0xb8   : > { %703 = vmatprep.subr.bf16.mxu0 %v1706_v14  ;;  %v1727_v14 = vld [vmem:[#allocation7 + $0x20] sm:$0xff]  }
  0xb9   : > { %1514 = vmatpush3.bf16.msra.mxu1 %v1719_v21  ;;  %v1734_v21 = vld [vmem:[#allocation8 + $0x18] sm:$0xff]  }
  0xba   : > { %1515 = vmatprep.subr.bf16.mxu1 %v1983_v1 }
  0xbb   : > { %704 = vmatpush1.bf16.msra.mxu0 %v1708_v15  ;;  %v1728_v15 = vld [vmem:[#allocation7 + $0x28] sm:$0xff]  }
  0xbc   : > { %705 = vmatprep.subr.bf16.mxu0 %v1709_v17  ;;  %v1730_v17 = vld [vmem:[#allocation7 + $0x38] sm:$0xff]  }
  0xbd   : > { %1516 = vmatpush3.bf16.msra.mxu1 %v1720_v24 }
  0xbe   : > { %1517 = vmatprep.subr.bf16.mxu1 %v1983_v1 }
  0xbf   : > { %706 = vmatpush1.bf16.msra.mxu0 %v1711_v19  ;;  %v1732_v19 = vld [vmem:[#allocation8 + $0x8] sm:$0xff]  }
  0xc0   : > { %707 = vmatprep.subr.bf16.mxu0 %v1712_v20  ;;  %v1733_v20 = vld [vmem:[#allocation8 + $0x10] sm:$0xff]  }
  0xc1   : > { %1518 = vmatpush3.bf16.msra.mxu1 %v1721_v26 }
  0xc2   : > { %1519 = vmatprep.subr.bf16.mxu1 %v1983_v1 }
  0xc3   : > { %708 = vmatpush1.bf16.msra.mxu0 %v1714_v22  ;;  %v1735_v22 = vld [vmem:[#allocation8 + $0x20] sm:$0xff]  }
  0xc4   : > { %1537 = vmatprep.subr.bf16.mxu0 %v1983_v1 }
  0xc5   : > { %1520 = vmatpush3.bf16.msra.mxu1 %v1722_v27 }
  0xc6   : > { %726 = vmatmul.mubr.bf16.vlgmr.msra.gmra.mrb[0].mxu0 %v515_v25  ;;  %1525 = vmatprep.subr.bf16.mxu1 %v1983_v1 }
  0xc7   : > { %1553 = vmatprep.mubr.msk.bf16.mxu0 %vm1984_vm0, %v1983_v1  ;;  %1538 = vmatpush3.bf16.msra.mxu0 %v1723_v4 }
  0xc8   : > { %1522 = vmatmul.mubr.bf16.vlgmr.msra.gmra.mrb[0].mxu1 %v515_v25  ;;  %1539 = vmatprep.subr.bf16.mxu0 %v1983_v1 }
  0xc9   : > { %1527 = vmatprep.mubr.msk.bf16.mxu1 %vm1984_vm0, %v1983_v1 }
  0xcb   : > { %1540 = vmatpush3.bf16.msra.mxu0 %v1724_v11  ;;  %v1452_v11 = vld [vmem:[%s2463_s15] ss:$0 sm:$0xff]  ;;  %s2379_s15 = scalar_lea.hbm %s2466_s20, %s1462_s10 }
  0xcc   : > { %1541 = vmatprep.subr.bf16.mxu0 %v1983_v1 }
  0xcf   : > { %1542 = vmatpush3.bf16.msra.mxu0 %v1725_v12 }
  0xd0   : > { %1543 = vmatprep.subr.bf16.mxu0 %v1983_v1 }
  0xd3   : > { %1544 = vmatpush3.bf16.msra.mxu0 %v1726_v13 }
  0xd4   : > { %1545 = vmatprep.subr.bf16.mxu0 %v1983_v1 }
  0xd7   : > { %1546 = vmatpush3.bf16.msra.mxu0 %v1727_v14 }
  0xd8   : > { %1547 = vmatprep.subr.bf16.mxu0 %v1983_v1 }
  0xdb   : > { %1548 = vmatpush3.bf16.msra.mxu0 %v1728_v15 }
  0xdc   : > { %1549 = vmatprep.subr.bf16.mxu0 %v1983_v1 }
  0xdf   : > { %1550 = vmatpush3.bf16.msra.mxu0 %v1729_v16 }
  0xe0   : > { %1551 = vmatprep.subr.bf16.mxu0 %v1983_v1 }
  0xe3   : > { %1552 = vmatpush3.bf16.msra.mxu0 %v1730_v17 }
  0xe4   : > { %1577 = vmatprep.subr.bf16.mxu0 %v1983_v1 }
 0x199   : > { %v727_v35 = vpop.f32.mrb[0].mxu0 }
 0x19a   : > { %v729_v36 = vpop.f32.mrb[1].mxu0  ;;  %v728_v39 = vadd.f32 %v727_v35, %v553_v34  ;;  %v1433_v35 = vld [vmem:[%s2427_s4] ss:$0 sm:$0xff] }
 0x19b   : > { %v730_v37 = vadd.f32 %v729_v36, %v557_v33  ;;  %v731_v38 = vpop.f32.mrb[2].mxu0  ;;  %v768_v46 = vpop.f32.mrb[0].mxu1  ;;  %v1432_v33 = vld [vmem:[%s2426_s3] ss:$0 sm:$0xff] }
 0x19c   : > { %v732_v40 = vpop.f32.mrb[3].mxu0  ;;  %v774_v42 = vmul.f32 0.17677669, %v728_v39  ;;  %v769_v47 = vadd.f32 %v768_v46, %v561_v45  ;;  %v1523_v48 = vpop.f32.mrb[1].mxu1  ;;  %v1737_v39 = vld [vmem:[#allocation8 + $0x30] sm:$0xff]  }
 0x19d   : > { %v776_v41 = vpack.c.bf16 %v730_v37, %v730_v37  ;;  %v771_v49 = vpop.f32.mrb[2].mxu1  ;;  %v1738_v40 = vld [vmem:[#allocation8 + $0x38] sm:$0xff]  }
 0x19e   : > { %v775_v43 = vpack.c.bf16 %v774_v42, %v774_v42  ;;  %v777_v50 = vpack.c.bf16 %v769_v47, %v769_v47  ;;  %v1524_v51 = vpop.f32.mrb[3].mxu1  ;;  %v1443_v49 = vld [vmem:[%s2462_s30] ss:$0 sm:$0xff] }
 0x19f   : > { %1526 = vmatpush3.bf16.xpose.msra.mxu1 %v776_v41  ;;  %v1434_v41 = vld [vmem:[%s2429_s6] ss:$0 sm:$0xff] }
 0x1a0   : > { %1531 = vmatprep.subr.bf16.mxu1 %v1983_v1  ;;  %v836_v52 = vsel %vm834_vm1, %v777_v50, 0 }
 0x1a6   : > { %1528 = vmatmul.mubr.bf16.vlgmr.msra.gmra.mrb[4].mxu1 %v775_v43 }
 0x1a7   : > { %1533 = vmatprep.mubr.msk.bf16.mxu1 %vm1984_vm0, %v1983_v1  ;;  %1532 = vmatpush3.bf16.msra.mxu1 %v836_v52 }
 0x1a8   : > { %1557 = vmatprep.subr.bf16.mxu1 %v1983_v1 }
 0x279   : > { %v812_v53 = vpop.f32.mrb[4].mxu1 }
 0x27a   : > { %v1529_v54 = vpop.f32.mrb[5].mxu1  ;;  %v819_v55 = vsel %vm818_vm2, %v812_v53, -inf }
 0x27b   : > { %820 = vmax.xlane.f32.xlu0 %v819_v55  ;;  %v815_v56 = vpop.f32.mrb[6].mxu1 }
 0x27c   : > { %v1530_v57 = vpop.f32.mrb[7].mxu1 }
 0x27d   : > { %v1739_v57 = vld [vmem:[#allocation10] sm:$0xff]  }
 0x308   : > { %v821_v58 = vpop.xlane.xlu0 %820 }
 0x309   : > { %v822_v59 = vsub.f32 %v812_v53, %v821_v58  ;;  %v1740_v58 = vld [vmem:[#allocation10 + $0x8] sm:$0xff]  }
 0x30b   : > { %v823_v60 = vmul.f32 1.442695, %v822_v59  ;;  %v1741_v59 = vld [vmem:[#allocation10 + $0x10] sm:$0xff]  }
 0x30d   : > { %1747 = vpow2.f32 %v823_v60  ;;  %v1742_v60 = vld [vmem:[#allocation10 + $0x18] sm:$0xff]  }
 0x317   : > { %v1748_v61 = vpop.eup %1747 }
 0x318   : > { %v825_v62 = vsel %vm818_vm2, %v1748_v61, 0.0 }
 0x319   : > { %826 = vadd.xlane.f32.xlu0 %v825_v62  ;;  %v1744_v62 = vld [vmem:[#allocation10 + $0x28] sm:$0xff]  }
 0x3a6   : > { %v827_v63 = vpop.xlane.xlu0 %826 }
 0x3a7   : > { %1749 = vrcp.f32 %v827_v63  ;;  %v1745_v63 = vld [vmem:[#allocation10 + $0x30] sm:$0xff]  }
 0x3b1   : > { %v1750_v0 = vpop.eup %1749 }
 0x3b2   : > { %v829_v2 = vmul.f32 %v1750_v0, %v1748_v61  ;;  %v1743_v61 = vld [vmem:[#allocation10 + $0x20] sm:$0xff]   ;;  %v1746_v0 = vld [vmem:[#allocation10 + $0x38] sm:$0xff]  }
 0x3b4   : > { %v830_v3 = vpack.c.bf16 %v829_v2, %v829_v2 }
 0x3b6   : > { %1534 = vmatmul.mubr.msk.bf16.vlgmr.msra.gmra.mrb[8].mxu1 %vm818_vm2, %v830_v3 }
 0x3b7   : > { %1573 = vmatprep.mubr.msk.bf16.mxu1 %vm1984_vm0, %v1983_v1  ;;  %1558 = vmatpush3.bf16.msra.mxu1 %v1731_v18 }
 0x3b8   : > { %1559 = vmatprep.subr.bf16.mxu1 %v1983_v1 }
 0x3bb   : > { %1560 = vmatpush3.bf16.msra.mxu1 %v1732_v19 }
 0x3bc   : > { %1561 = vmatprep.subr.bf16.mxu1 %v1983_v1 }
 0x3bf   : > { %1562 = vmatpush3.bf16.msra.mxu1 %v1733_v20 }
 0x3c0   : > { %1563 = vmatprep.subr.bf16.mxu1 %v1983_v1 }
 0x3c3   : > { %1564 = vmatpush3.bf16.msra.mxu1 %v1734_v21 }
 0x3c4   : > { %1565 = vmatprep.subr.bf16.mxu1 %v1983_v1 }
 0x3c7   : > { %1566 = vmatpush3.bf16.msra.mxu1 %v1735_v22  ;;  %v1185_v22 = vld [vmem:[%s2465_s8] sm:$0x1] }
 0x3c8   : > { %1567 = vmatprep.subr.bf16.mxu1 %v1983_v1 }
 0x489   : > { %v872_v5 = vpop.f32.mrb[8].mxu1 }
 0x48a   : > { %v873_v6 = vadd.f32 %v872_v5, %v2300_v23  ;;  %v1535_v7 = vpop.f32.mrb[9].mxu1  ;;  %v1736_v23 = vld [vmem:[#allocation8 + $0x28] sm:$0xff]  }
 0x48b   : > { %v875_v8 = vpop.f32.mrb[10].mxu1  ;;  %1568 = vmatpush3.bf16.msra.mxu1 %v1736_v23 }
 0x48c   : > { %880 = vadd.xlane.f32.xlu1 %v873_v6  ;;  %v1536_v9 = vpop.f32.mrb[11].mxu1  ;;  %v883_v10 = vmul.f32 %v873_v6, %v873_v6  ;;  %1569 = vmatprep.subr.bf16.mxu1 %v1983_v1 }
 0x48f   : > { %1570 = vmatpush3.bf16.msra.mxu1 %v1737_v39 }
 0x490   : > { %884 = vadd.xlane.f32.xlu1 %v883_v10  ;;  %1571 = vmatprep.subr.bf16.mxu1 %v1983_v1 }
 0x493   : > { %1572 = vmatpush3.bf16.msra.mxu1 %v1738_v40 }
 0x519   : > { %v881_v24 = vpop.xlane.xlu1 %880 }
 0x51a   : > { %v882_v25 = vmul.f32 0.03125, %v881_v24 }
 0x51c   : > { %v887_v27 = vmul.f32 %v882_v25, %v882_v25  ;;  %v889_v31 = vsub.f32 %v873_v6, %v882_v25 }
 0x51d   : > { %v885_v26 = vpop.xlane.xlu1 %884 }
 0x51e   : > { %v886_v28 = vmul.f32 0.03125, %v885_v26 }
 0x520   : > { %v888_v29 = vsub.f32 %v886_v28, %v887_v27 }
 0x522   : > { %v890_v30 = vadd.f32 1e-05, %v888_v29 }
 0x524   : > { %1751 = vrsqrt.f32 %v890_v30 }
 0x52e   : > { %v1752_v32 = vpop.eup %1751 }
 0x52f   : > { %v892_v34 = vmul.f32 %v1752_v32, %v889_v31 }
 0x531   : > { %v899_v36 = vmul.f32 %v1432_v33, %v892_v34 }
 0x533   : > { %v906_v37 = vadd.f32 %v1433_v35, %v899_v36 }
 0x535   : > { %v907_v38 = vpack.c.bf16 %v906_v37, %v906_v37 }
 0x537   : > { %1554 = vmatmul.mubr.bf16.vlgmr.msra.gmra.mrb[4].mxu0 %v907_v38 }
 0x538   : > { %1593 = vmatprep.mubr.msk.bf16.mxu0 %vm1984_vm0, %v1983_v1  ;;  %1578 = vmatpush3.bf16.msra.mxu0 %v1739_v57 }
 0x539   : > { %1579 = vmatprep.subr.bf16.mxu0 %v1983_v1 }
 0x53c   : > { %1580 = vmatpush3.bf16.msra.mxu0 %v1740_v58 }
 0x53d   : > { %1581 = vmatprep.subr.bf16.mxu0 %v1983_v1 }
 0x540   : > { %1582 = vmatpush3.bf16.msra.mxu0 %v1741_v59 }
 0x541   : > { %1583 = vmatprep.subr.bf16.mxu0 %v1983_v1 }
 0x544   : > { %1584 = vmatpush3.bf16.msra.mxu0 %v1742_v60 }
 0x545   : > { %1585 = vmatprep.subr.bf16.mxu0 %v1983_v1 }
 0x548   : > { %1586 = vmatpush3.bf16.msra.mxu0 %v1743_v61 }
 0x549   : > { %1587 = vmatprep.subr.bf16.mxu0 %v1983_v1 }
 0x54c   : > { %1588 = vmatpush3.bf16.msra.mxu0 %v1744_v62 }
 0x54d   : > { %1589 = vmatprep.subr.bf16.mxu0 %v1983_v1 }
 0x550   : > { %1590 = vmatpush3.bf16.msra.mxu0 %v1745_v63 }
 0x551   : > { %1591 = vmatprep.subr.bf16.mxu0 %v1983_v1  ;;  %v1453_v1 = vld [vmem:[%s2464_s13] ss:$0 sm:$0xff]  ;;  %s1901_s13 = sshll.u32 %s1985_s18, 4  ;;  %s1902_s13 = int_to_ptr.vmem [resolvable:$false] %s1901_s13 }
 0x552   : > { %s1903_s12 = scalar_lea.vmem %s1902_s13, 32  ;;  %p1904_p10 = scmp.lt.s32.totalorder %s2381_s21, %s1902_s13 }
 0x553   : > { %p1905_p1 = scmp.lt.s32.totalorder %s1903_s12, %s1897_s14 }
 0x554   : > { %1592 = vmatpush3.bf16.msra.mxu0 %v1746_v0 }
 0x555   : > { %p1906_p11 = por %p1905_p1, %p1904_p10 }
 0x557   : > { %p1907_p12 = pnand %p1906_p11, %p1900_p5 }
 0x60a   : > { %v1013_v42 = vpop.f32.mrb[4].mxu0 }
 0x60b   : > { %v1014_v43 = vadd.f32 %v1434_v41, %v1013_v42  ;;  %v1555_v44 = vpop.f32.mrb[5].mxu0 }
 0x60c   : > { %v1016_v45 = vpop.f32.mrb[6].mxu0 }
 0x60d   : > { %v1019_v46 = vmax.f32 %v1014_v43, 0.0  ;;  %v1556_v47 = vpop.f32.mrb[7].mxu0 }
 0x60f   : > { %v1020_v48 = vpack.c.bf16 %v1019_v46, %v1019_v46 }
 0x611   : > { %1574 = vmatmul.mubr.bf16.vlgmr.msra.gmra.mrb[12].mxu1 %v1020_v48 }
 0x6e4   : > { %v1126_v50 = vpop.f32.mrb[12].mxu1 }
 0x6e5   : > { %v1127_v51 = vadd.f32 %v1443_v49, %v1126_v50  ;;  %v1575_v52 = vpop.f32.mrb[13].mxu1 }
 0x6e6   : > { %v1129_v53 = vpop.f32.mrb[14].mxu1 }
 0x6e7   : > { %v1132_v54 = vadd.f32 %v1127_v51, %v906_v37  ;;  %v1576_v55 = vpop.f32.mrb[15].mxu1 }
 0x6e9   : > { %1135 = vadd.xlane.f32.xlu0 %v1132_v54  ;;  %v1138_v56 = vmul.f32 %v1132_v54, %v1132_v54 }
 0x6eb   : > { %1139 = vadd.xlane.f32.xlu1 %v1138_v56 }
 0x776   : > { %v1136_v2 = vpop.xlane.xlu0 %1135 }
 0x777   : > { %v1137_v3 = vmul.f32 0.03125, %v1136_v2 }
 0x778   : > { %v1140_v4 = vpop.xlane.xlu1 %1139 }
 0x779   : > { %v1142_v5 = vmul.f32 %v1137_v3, %v1137_v3  ;;  %v1141_v6 = vmul.f32 0.03125, %v1140_v4  ;;  %v1144_v9 = vsub.f32 %v1132_v54, %v1137_v3 }
 0x77b   : > { %v1143_v7 = vsub.f32 %v1141_v6, %v1142_v5 }
 0x77d   : > { %v1145_v8 = vadd.f32 1e-05, %v1143_v7 }
 0x77f   : > { %1753 = vrsqrt.f32 %v1145_v8 }
 0x789   : > { %v1754_v10 = vpop.eup %1753 }
 0x78a   : > { %v1147_v12 = vmul.f32 %v1754_v10, %v1144_v9 }
 0x78c   : > { %v1154_v13 = vmul.f32 %v1452_v11, %v1147_v12 }
 0x78e   : > { %v1161_v14 = vadd.f32 %v1453_v1, %v1154_v13 }
 0x790   : > { %v1162_v15 = vrot.slane %v1161_v14, 4 }
 0x792   : > { %v1163_v16 = vmax.f32 %v1161_v14, %v1162_v15 }
 0x794   : > { %v1164_v17 = vrot.slane %v1163_v16, 2 }
 0x796   : > { %v1165_v18 = vmax.f32 %v1163_v16, %v1164_v17 }
 0x798   : > { %v1166_v19 = vrot.slane %v1165_v18, 1 }
 0x79a   : > { %v1167_v20 = vmax.f32 %v1165_v18, %v1166_v19 }
 0x79c   : > { %v1168_v21 = vpack.c.bf16 %v1167_v20, %v1167_v20 }
 0x79e   : > { %1594 = vmatmul.mubr.bf16.vlgmr.msra.gmra.mrb[8].mxu0 %v1168_v21 }
 0x871   : > { %v1268_v23 = vpop.f32.mrb[8].mxu0 }
 0x872   : > { %v1269_v24 = vadd.f32 %v1268_v23, %v1185_v22  ;;  %v1595_v25 = vpop.f32.mrb[9].mxu0 }
 0x873   : > { %v1271_v26 = vpop.f32.mrb[10].mxu0 }
 0x874   : > { %1274 = vst [vmem:[%s512_s19] sm:$0x1] %v1269_v24  ;;  %v1596_v27 = vpop.f32.mrb[11].mxu0 }
 0x875   : > { %1910 = shalt.err (!%p1907_p12)
}
 0x876   : > { %s1911_s1 = scalar_lea.hbm %s2379_s15, 16  ;;  %s1915_s10 = scalar_lea.hbm %s2466_s20, 32 }
 0x877   : > { %p1912_p13 = scmp.ne.s32.totalorder %s2379_s15, %s1911_s1  ;;  %p1916_p9 = scmp.lt.u32.totalorder %s2379_s15, %s2466_s20 }
 0x878   : > { %p1917_p4 = scmp.lt.u32.totalorder %s1915_s10, %s1911_s1  ;;  %p1919_p6 = scmp.lt.u32.totalorder %s1911_s1, %s2379_s15 }
 0x879   : > { %p1913_p3 = pnand %p1912_p13, %p2467_p0 }
 0x87a   : > { %p1918_p8 = por %p1917_p4, %p1916_p9 }
 0x87b   : > { %p1914_p7 = pneg %p1913_p3 }
 0x87c   : > { %p1920_p2 = por %p1919_p6, %p1918_p8 }
 0x87e   : > { %p1921_p5 = pnand %p1920_p2, %p1914_p7 }
 0x880   : > { %1924 = shalt.err (!%p1921_p5)
}
 0x881   : > { %1615 = dma.vmem_to_hbm [thread:$0]  (%p2467_p0), %s2381_s21, 16, %s2379_s15, %s1276_s9  }
 0x882 PF: > { %s1300_s29 = sand.u32 1, %s1959_s25   ;;  %p2468_p10 = scmp.ne.s32.totalorder %s2455_s17, 0 }
 0x883   : > { %p2469_p1 = scmp.ge.s32.totalorder %s1971_s28, 2  ;;  %s1301_s14 = scalar_lea.sflag [#allocation4], %s1300_s29 }
 0x885   : > { %p1635_p11 = pnand %p2469_p1, %p2468_p10 }
 0x887   : > { %1954 = dma.done.wait (!%p1635_p11), %s1301_s14, 16  }
 0x888   : > { %1956 = vsyncadd (!%p1635_p11), %s1301_s14, 4294967280  ;;  %p28_p12 = scmp.ge.s32.totalorder %s2201_s16, 4   ;;  %s2470_s25 = smov %s1963_s26 }
 0x889   : > { %s2471_s26 = smov %s1967_s27  ;;  %s2472_s27 = smov %s2212_s24 }
 0x88a   : > { %s2473_s28 = smov %s2201_s16  ;;  %30 = sbr.rel (!%p28_p12) target bundleno = 14 (0xe), region = 133 }
 0x891   :  { %1305 = vsyncpa [#allocation3], 1 }
 0x892   :  { %1307 = vsyncpa [#allocation3 + $0x1], 1 }
 0x893   :  { %1308 = vsyncpa [#allocation6], 1 }
 0x894   :  { %1309 = vsyncpa [#allocation9], 1 }
 0x895   :  { %1310 = vsyncpa [#allocation4], 1 }
 0x896   :  { %1312 = vsyncpa [#allocation4 + $0x1], 1 }

</bundles_post_ra>
